<compile_context>
chip_gen: v6e
topology: v6e:2x2x1
jax: 0.10.0
libtpu: 0.0.40
codegen_flags: <defaults>
</compile_context>

<pallas_src>
import functools

import jax
import jax.numpy as jnp
from jax.experimental import pallas as pl
from jax.experimental.pallas import tpu as pltpu


# --- unused-but-present module "parameters" (deterministic init, as in __init__) ---
MEAN = jnp.array([0.0, 0.0, 0.0, 0.0], dtype=jnp.float32)
STD_BOX = jnp.array([0.1, 0.1, 0.2, 0.2], dtype=jnp.float32)
STD_LDM = jnp.ones((1, 10), dtype=jnp.float32) * 0.1

_LANE = 128


def _round_up(x, m):
    return ((x + m - 1) // m) * m


def _regression_kernel(a_ref, d_ref, l_ref, box_ref, ldm_ref, *, clamp_max):
    # Channel-major, lane-dense blocks (anchor index on the 128-lane axis):
    #   a_ref / d_ref : (4, TILE)   box_ref : (4, TILE)
    #   l_ref         : (10, TILE)  ldm_ref : (10, TILE)
    # All math runs on (2, TILE) dense slabs; no transposes, no concatenates.
    a = a_ref[...].astype(jnp.float32)                      # (4, TILE)
    d = d_ref[...].astype(jnp.float32)                      # (4, TILE)
    l = l_ref[...].astype(jnp.float32)                      # (10, TILE)

    wh = a[2:4, :] - a[0:2, :]                              # [w ; h]
    ctr = a[0:2, :] + 0.5 * wh                              # [cx; cy]

    pred_ctr = ctr + d[0:2, :] * wh                         # [pred_cx; pred_cy]
    half = 0.5 * jnp.exp(d[2:4, :]) * wh                    # [w/2 ; h/2] predicted

    # Boxes: write the two halves straight into the output ref (lane-dense vst).
    box_ref[0:2, :] = jnp.clip(pred_ctr - half, 0.0, clamp_max).astype(box_ref.dtype)
    box_ref[2:4, :] = jnp.clip(pred_ctr + half, 0.0, clamp_max).astype(box_ref.dtype)

    # Landmarks: 5 (x, y) pairs, each ctr + delta * wh; direct slice stores.
    for k in range(5):
        pt = ctr + l[2 * k:2 * k + 2, :] * wh
        ldm_ref[2 * k:2 * k + 2, :] = jnp.clip(pt, 0.0, clamp_max).astype(ldm_ref.dtype)


def _choose_tiling(bn, tile_n):
    """Pick (tile, steps, padded_bn): tile % 128 == 0, steps * tile == padded_bn."""
    n128 = _round_up(max(bn, 1), _LANE)
    tile_cap = max(_LANE, (int(tile_n) // _LANE) * _LANE)
    steps = pl.cdiv(n128, tile_cap)
    # >= 2 parallel steps whenever possible -> megacore sharding on v7x and a
    # pipelined DMA/compute overlap; keep single step only for tiny problems.
    if steps < 2 and n128 >= 2 * _LANE:
        steps = 2
    tile = _round_up(pl.cdiv(n128, steps), _LANE)
    return tile, steps, tile * steps


def regression_transform(anchors, bbox_deltas, ldm_deltas, img, *, tile_n=32768):
    """anchors/bbox_deltas: (B, N, 4); ldm_deltas: (B, N, 10); img: (B, C, H, W)."""
    B, N, _ = anchors.shape
    BN = B * N
    clamp_max = float(img.shape[2])          # torch.clamp(..., min=0, max=H)
    out_dtype = jnp.result_type(anchors.dtype, bbox_deltas.dtype, ldm_deltas.dtype)

    tile, steps, n_pad = _choose_tiling(BN, tile_n)

    def _prep(x, c):
        # (B, N, C) -> (BN, C) is a free reshape; pad the anchor axis so every
        # grid step sees a full block (zero padding -> exp(0) stays finite);
        # then one XLA relayout to channel-major (C, n_pad) so the kernel's
        # last dim is 128-dense.
        x2 = x.reshape(BN, c)
        if n_pad != BN:
            x2 = jnp.pad(x2, ((0, n_pad - BN), (0, 0)))
        return jnp.transpose(x2)             # (C, n_pad)

    a_t = _prep(anchors, 4)
    d_t = _prep(bbox_deltas, 4)
    l_t = _prep(ldm_deltas, 10)

    itemsize = jnp.dtype(out_dtype).itemsize
    in_bytes = sum(int(x.size) * x.dtype.itemsize for x in (a_t, d_t, l_t))
    cost = pl.CostEstimate(
        flops=70 * n_pad,                    # cheap elementwise decode
        transcendentals=2 * n_pad,           # exp(dw), exp(dh)
        bytes_accessed=int(in_bytes + 14 * n_pad * itemsize),
    )

    kernel = functools.partial(_regression_kernel, clamp_max=clamp_max)

    boxes_t, ldms_t = pl.pallas_call(
        kernel,
        out_shape=(jax.ShapeDtypeStruct((4, n_pad), out_dtype),
                   jax.ShapeDtypeStruct((10, n_pad), out_dtype)),
        grid=(steps,),
        in_specs=[
            pl.BlockSpec((4, tile), lambda i: (0, i)),
            pl.BlockSpec((4, tile), lambda i: (0, i)),
            pl.BlockSpec((10, tile), lambda i: (0, i)),
        ],
        out_specs=[
            pl.BlockSpec((4, tile), lambda i: (0, i)),
            pl.BlockSpec((10, tile), lambda i: (0, i)),
        ],
        compiler_params=pltpu.CompilerParams(
            dimension_semantics=("parallel",),      # shards steps across v7x's 2 TCs
            vmem_limit_bytes=32 * 1024 * 1024,      # safe on v5e/v6e/v7x
        ),
        cost_estimate=cost,
    )(a_t, d_t, l_t)

    # Layout plumbing back to the module's (B, N, C) outputs.
    boxes = jnp.transpose(boxes_t[:, :BN]).reshape(B, N, 4)
    ldms = jnp.transpose(ldms_t[:, :BN]).reshape(B, N, 10)
    return boxes, ldms


def _reference(anchors, bbox_deltas, ldm_deltas, img):
    """Pure-JAX mirror of the PyTorch forward, for verification."""
    widths = anchors[:, :, 2] - anchors[:, :, 0]
    heights = anchors[:, :, 3] - anchors[:, :, 1]
    ctr_x = anchors[:, :, 0] + 0.5 * widths
    ctr_y = anchors[:, :, 1] + 0.5 * heights
    dx, dy, dw, dh = (bbox_deltas[:, :, i] for i in range(4))
    pcx = ctr_x + dx * widths
    pcy = ctr_y + dy * heights
    pw = jnp.exp(dw) * widths
    ph = jnp.exp(dh) * heights
    boxes = jnp.stack([pcx - 0.5 * pw, pcy - 0.5 * ph,
                       pcx + 0.5 * pw, pcy + 0.5 * ph], axis=2)
    pts = []
    for k in range(5):
        pts.append(ctr_x + ldm_deltas[:, :, 2 * k] * widths)
        pts.append(ctr_y + ldm_deltas[:, :, 2 * k + 1] * heights)
    ldms = jnp.stack(pts, axis=2)
    H = img.shape[2]
    return jnp.clip(boxes, 0, H), jnp.clip(ldms, 0, H)


if __name__ == "__main__":
    key = jax.random.PRNGKey(0)
    k1, k2, k3, k4, k5 = jax.random.split(key, 5)

    B, N = 2, 512          # B*N = 1024 anchors
    C, H, W = 3, 16, 16

    # well-formed anchors: x1 < x2, y1 < y2
    xy1 = jax.random.uniform(k1, (B, N, 2), jnp.float32, 0.0, 8.0)
    wh = jax.random.uniform(k2, (B, N, 2), jnp.float32, 1.0, 8.0)
    anchors = jnp.concatenate([xy1, xy1 + wh], axis=2)                 # (B, N, 4)
    bbox_deltas = 0.1 * jax.random.normal(k3, (B, N, 4), jnp.float32)  # (B, N, 4)
    ldm_deltas = 0.1 * jax.random.normal(k4, (B, N, 10), jnp.float32)  # (B, N, 10)
    img = jax.random.normal(k5, (B, C, H, W), jnp.float32)             # NCHW

    # tile_n=256 -> 4 grid steps, exercising the pipelined "parallel" axis.
    pred_boxes, pred_landmarks = regression_transform(
        anchors, bbox_deltas, ldm_deltas, img, tile_n=256)
    jax.block_until_ready((pred_boxes, pred_landmarks))

    ref_boxes, ref_ldms = _reference(anchors, bbox_deltas, ldm_deltas, img)
    assert pred_boxes.shape == (B, N, 4) and pred_landmarks.shape == (B, N, 10)
    assert jnp.allclose(pred_boxes, ref_boxes, atol=1e-5, rtol=1e-5)
    assert jnp.allclose(pred_landmarks, ref_ldms, atol=1e-5, rtol=1e-5)

    print("KERNEL_OK")
</pallas_src>

<mosaic_0001>
module attributes {stable_mosaic.version = 11 : i64} {
  func.func @_regression_kernel(%arg0: i32, %arg1: memref<4x256xf32, #tpu.memory_space<vmem>>, %arg2: memref<4x256xf32, #tpu.memory_space<vmem>>, %arg3: memref<10x256xf32, #tpu.memory_space<vmem>>, %arg4: memref<4x256xf32, #tpu.memory_space<vmem>>, %arg5: memref<10x256xf32, #tpu.memory_space<vmem>>) attributes {dimension_semantics = [#tpu.dimension_semantics<parallel>], iteration_bounds = array<i64: 4>, scalar_prefetch = 0 : i64, scratch_operands = 0 : i64, tpu.core_type = #tpu.core_type<tc>, window_params = [{transform_indices = @transform_0, window_bounds = array<i64: 4, 256>}, {transform_indices = @transform_1, window_bounds = array<i64: 4, 256>}, {transform_indices = @transform_2, window_bounds = array<i64: 10, 256>}, {transform_indices = @transform_3, window_bounds = array<i64: 4, 256>}, {transform_indices = @transform_4, window_bounds = array<i64: 10, 256>}]} {
    %c0 = arith.constant 0 : index
    %c0_0 = arith.constant 0 : index
    %0 = vector.load %arg1[%c0, %c0_0] : memref<4x256xf32, #tpu.memory_space<vmem>>, vector<4x256xf32>
    %c0_1 = arith.constant 0 : index
    %c0_2 = arith.constant 0 : index
    %1 = vector.load %arg2[%c0_1, %c0_2] : memref<4x256xf32, #tpu.memory_space<vmem>>, vector<4x256xf32>
    %c0_3 = arith.constant 0 : index
    %c0_4 = arith.constant 0 : index
    %2 = vector.load %arg3[%c0_3, %c0_4] : memref<10x256xf32, #tpu.memory_space<vmem>>, vector<10x256xf32>
    %3 = vector.extract_strided_slice %0 {offsets = [2, 0], sizes = [2, 256], strides = [1, 1]} : vector<4x256xf32> to vector<2x256xf32>
    %4 = vector.extract_strided_slice %0 {offsets = [0, 0], sizes = [2, 256], strides = [1, 1]} : vector<4x256xf32> to vector<2x256xf32>
    %5 = arith.subf %3, %4 : vector<2x256xf32>
    %6 = vector.extract_strided_slice %0 {offsets = [0, 0], sizes = [2, 256], strides = [1, 1]} : vector<4x256xf32> to vector<2x256xf32>
    %cst = arith.constant 5.000000e-01 : f32
    %7 = vector.broadcast %cst : f32 to vector<2x256xf32>
    %8 = arith.mulf %7, %5 : vector<2x256xf32>
    %9 = arith.addf %6, %8 : vector<2x256xf32>
    %10 = vector.extract_strided_slice %1 {offsets = [0, 0], sizes = [2, 256], strides = [1, 1]} : vector<4x256xf32> to vector<2x256xf32>
    %11 = arith.mulf %10, %5 : vector<2x256xf32>
    %12 = arith.addf %9, %11 : vector<2x256xf32>
    %13 = vector.extract_strided_slice %1 {offsets = [2, 0], sizes = [2, 256], strides = [1, 1]} : vector<4x256xf32> to vector<2x256xf32>
    %14 = math.exp %13 : vector<2x256xf32>
    %cst_5 = arith.constant 5.000000e-01 : f32
    %15 = vector.broadcast %cst_5 : f32 to vector<2x256xf32>
    %16 = arith.mulf %15, %14 : vector<2x256xf32>
    %17 = arith.mulf %16, %5 : vector<2x256xf32>
    %18 = arith.subf %12, %17 : vector<2x256xf32>
    %cst_6 = arith.constant 0.000000e+00 : f32
    %cst_7 = arith.constant 1.600000e+01 : f32
    %19 = vector.broadcast %cst_6 : f32 to vector<2x256xf32>
    %20 = arith.maximumf %19, %18 : vector<2x256xf32>
    %21 = vector.broadcast %cst_7 : f32 to vector<2x256xf32>
    %22 = arith.minimumf %21, %20 : vector<2x256xf32>
    %c0_8 = arith.constant 0 : index
    %c0_9 = arith.constant 0 : index
    %23 = vector.load %arg4[%c0_8, %c0_9] : memref<4x256xf32, #tpu.memory_space<vmem>>, vector<2x256xf32>
    tpu.vector_store %arg4[%c0_8, %c0_9], %22 {strides = array<i32>} : memref<4x256xf32, #tpu.memory_space<vmem>>, vector<2x256xf32>,
    %24 = arith.addf %12, %17 : vector<2x256xf32>
    %cst_10 = arith.constant 0.000000e+00 : f32
    %cst_11 = arith.constant 1.600000e+01 : f32
    %25 = vector.broadcast %cst_10 : f32 to vector<2x256xf32>
    %26 = arith.maximumf %25, %24 : vector<2x256xf32>
    %27 = vector.broadcast %cst_11 : f32 to vector<2x256xf32>
    %28 = arith.minimumf %27, %26 : vector<2x256xf32>
    %c2 = arith.constant 2 : index
    %c0_12 = arith.constant 0 : index
    %29 = vector.load %arg4[%c2, %c0_12] : memref<4x256xf32, #tpu.memory_space<vmem>>, vector<2x256xf32>
    tpu.vector_store %arg4[%c2, %c0_12], %28 {strides = array<i32>} : memref<4x256xf32, #tpu.memory_space<vmem>>, vector<2x256xf32>,
    %30 = vector.extract_strided_slice %2 {offsets = [0, 0], sizes = [2, 256], strides = [1, 1]} : vector<10x256xf32> to vector<2x256xf32>
    %31 = arith.mulf %30, %5 : vector<2x256xf32>
    %32 = arith.addf %9, %31 : vector<2x256xf32>
    %cst_13 = arith.constant 0.000000e+00 : f32
    %cst_14 = arith.constant 1.600000e+01 : f32
    %33 = vector.broadcast %cst_13 : f32 to vector<2x256xf32>
    %34 = arith.maximumf %33, %32 : vector<2x256xf32>
    %35 = vector.broadcast %cst_14 : f32 to vector<2x256xf32>
    %36 = arith.minimumf %35, %34 : vector<2x256xf32>
    %c0_15 = arith.constant 0 : index
    %c0_16 = arith.constant 0 : index
    %37 = vector.load %arg5[%c0_15, %c0_16] : memref<10x256xf32, #tpu.memory_space<vmem>>, vector<2x256xf32>
    tpu.vector_store %arg5[%c0_15, %c0_16], %36 {strides = array<i32>} : memref<10x256xf32, #tpu.memory_space<vmem>>, vector<2x256xf32>,
    %38 = vector.extract_strided_slice %2 {offsets = [2, 0], sizes = [2, 256], strides = [1, 1]} : vector<10x256xf32> to vector<2x256xf32>
    %39 = arith.mulf %38, %5 : vector<2x256xf32>
    %40 = arith.addf %9, %39 : vector<2x256xf32>
    %cst_17 = arith.constant 0.000000e+00 : f32
    %cst_18 = arith.constant 1.600000e+01 : f32
    %41 = vector.broadcast %cst_17 : f32 to vector<2x256xf32>
    %42 = arith.maximumf %41, %40 : vector<2x256xf32>
    %43 = vector.broadcast %cst_18 : f32 to vector<2x256xf32>
    %44 = arith.minimumf %43, %42 : vector<2x256xf32>
    %c2_19 = arith.constant 2 : index
    %c0_20 = arith.constant 0 : index
    %45 = vector.load %arg5[%c2_19, %c0_20] : memref<10x256xf32, #tpu.memory_space<vmem>>, vector<2x256xf32>
    tpu.vector_store %arg5[%c2_19, %c0_20], %44 {strides = array<i32>} : memref<10x256xf32, #tpu.memory_space<vmem>>, vector<2x256xf32>,
    %46 = vector.extract_strided_slice %2 {offsets = [4, 0], sizes = [2, 256], strides = [1, 1]} : vector<10x256xf32> to vector<2x256xf32>
    %47 = arith.mulf %46, %5 : vector<2x256xf32>
    %48 = arith.addf %9, %47 : vector<2x256xf32>
    %cst_21 = arith.constant 0.000000e+00 : f32
    %cst_22 = arith.constant 1.600000e+01 : f32
    %49 = vector.broadcast %cst_21 : f32 to vector<2x256xf32>
    %50 = arith.maximumf %49, %48 : vector<2x256xf32>
    %51 = vector.broadcast %cst_22 : f32 to vector<2x256xf32>
    %52 = arith.minimumf %51, %50 : vector<2x256xf32>
    %c4 = arith.constant 4 : index
    %c0_23 = arith.constant 0 : index
    %53 = vector.load %arg5[%c4, %c0_23] : memref<10x256xf32, #tpu.memory_space<vmem>>, vector<2x256xf32>
    tpu.vector_store %arg5[%c4, %c0_23], %52 {strides = array<i32>} : memref<10x256xf32, #tpu.memory_space<vmem>>, vector<2x256xf32>,
    %54 = vector.extract_strided_slice %2 {offsets = [6, 0], sizes = [2, 256], strides = [1, 1]} : vector<10x256xf32> to vector<2x256xf32>
    %55 = arith.mulf %54, %5 : vector<2x256xf32>
    %56 = arith.addf %9, %55 : vector<2x256xf32>
    %cst_24 = arith.constant 0.000000e+00 : f32
    %cst_25 = arith.constant 1.600000e+01 : f32
    %57 = vector.broadcast %cst_24 : f32 to vector<2x256xf32>
    %58 = arith.maximumf %57, %56 : vector<2x256xf32>
    %59 = vector.broadcast %cst_25 : f32 to vector<2x256xf32>
    %60 = arith.minimumf %59, %58 : vector<2x256xf32>
    %c6 = arith.constant 6 : index
    %c0_26 = arith.constant 0 : index
    %61 = vector.load %arg5[%c6, %c0_26] : memref<10x256xf32, #tpu.memory_space<vmem>>, vector<2x256xf32>
    tpu.vector_store %arg5[%c6, %c0_26], %60 {strides = array<i32>} : memref<10x256xf32, #tpu.memory_space<vmem>>, vector<2x256xf32>,
    %62 = vector.extract_strided_slice %2 {offsets = [8, 0], sizes = [2, 256], strides = [1, 1]} : vector<10x256xf32> to vector<2x256xf32>
    %63 = arith.mulf %62, %5 : vector<2x256xf32>
    %64 = arith.addf %9, %63 : vector<2x256xf32>
    %cst_27 = arith.constant 0.000000e+00 : f32
    %cst_28 = arith.constant 1.600000e+01 : f32
    %65 = vector.broadcast %cst_27 : f32 to vector<2x256xf32>
    %66 = arith.maximumf %65, %64 : vector<2x256xf32>
    %67 = vector.broadcast %cst_28 : f32 to vector<2x256xf32>
    %68 = arith.minimumf %67, %66 : vector<2x256xf32>
    %c8 = arith.constant 8 : index
    %c0_29 = arith.constant 0 : index
    %69 = vector.load %arg5[%c8, %c0_29] : memref<10x256xf32, #tpu.memory_space<vmem>>, vector<2x256xf32>
    tpu.vector_store %arg5[%c8, %c0_29], %68 {strides = array<i32>} : memref<10x256xf32, #tpu.memory_space<vmem>>, vector<2x256xf32>,
    return
  }
  func.func @transform_0(%arg0: i32) -> (i32, i32) {
    %c0_i32 = arith.constant 0 : i32
    %c0_i32_0 = arith.constant 0 : i32
    return %c0_i32, %arg0 : i32, i32
  }
  func.func @transform_1(%arg0: i32) -> (i32, i32) {
    %c0_i32 = arith.constant 0 : i32
    %c0_i32_0 = arith.constant 0 : i32
    return %c0_i32, %arg0 : i32, i32
  }
  func.func @transform_2(%arg0: i32) -> (i32, i32) {
    %c0_i32 = arith.constant 0 : i32
    %c0_i32_0 = arith.constant 0 : i32
    return %c0_i32, %arg0 : i32, i32
  }
  func.func @transform_3(%arg0: i32) -> (i32, i32) {
    %c0_i32 = arith.constant 0 : i32
    %c0_i32_0 = arith.constant 0 : i32
    return %c0_i32, %arg0 : i32, i32
  }
  func.func @transform_4(%arg0: i32) -> (i32, i32) {
    %c0_i32 = arith.constant 0 : i32
    %c0_i32_0 = arith.constant 0 : i32
    return %c0_i32, %arg0 : i32, i32
  }
}

</mosaic_0001>

<bundles_post_ra>
// kernel: tpu_custom_call.1
= control target key start
LH: loop header
LB: loop body
LE: loop exit
PB: predicated region body
PF: predicated region fallthrough
CT: control target
= control target key end

     0   :  { %s1210_s0 = inlined_call_operand.hbm [shape: f32[4,1024], index: 0, kind: input, shape index: {}]   ;;  %s1211_s1 = inlined_call_operand.hbm [shape: f32[4,1024], index: 1, kind: input, shape index: {}]   ;;  %s1212_s2 = inlined_call_operand.hbm [shape: f32[10,1024], index: 2, kind: input, shape index: {}]   ;;  %s1213_s3 = inlined_call_operand.hbm [shape: f32[4,1024], index: 3, kind: output, shape index: {0}]   ;;  %s1214_s4 = inlined_call_operand.hbm [shape: f32[10,1024], index: 4, kind: output, shape index: {1}]  }
   0x1   :  { %1220 = sst [smem:[#allocation17_spill]] %s1211_s1 }
   0x2   :  { %10 = vsyncpa [#allocation3], 0 }
   0x3   :  { %12 = vsyncpa [#allocation3 + $0x1], 0 }
   0x4   :  { %13 = vsyncpa [#allocation6], 0 }
   0x5   :  { %15 = vsyncpa [#allocation6 + $0x1], 0 }
   0x6   :  { %16 = vsyncpa [#allocation4], 0 }
   0x7   :  { %18 = vsyncpa [#allocation4 + $0x1], 0 }
   0x8   :  { %19 = vsyncpa [#allocation10], 0 }
   0x9   :  { %21 = vsyncpa [#allocation10 + $0x1], 0  ;;  %s941_s15 = smov 0   ;;  %s943_s16 = smov 0  }
   0xa   :  { %s945_s17 = smov 0   ;;  %s947_s18 = smov 0  }
   0xb LB: > { %1221 = sst [smem:[#allocation15_spill]] %s899_s17  ;;  %s962_s19 = sadd.s32 4294967295, %s903_s18   ;;  %s903_s18 = sphi %s947_s18, %s1240_s18   ;;  %s899_s17 = sphi %s945_s17, %s1237_s17   ;;  %s895_s16 = sphi %s943_s16, %s1239_s16   ;;  %s891_s15 = sphi %s941_s15, %s1238_s15  }
   0xc   : > { %s618_s20 = sadd.s32 4294967294, %s903_s18   ;;  %s966_s21 = sadd.s32 1, %s903_s18  }
   0xd   : > { %s34_s22 = sadd.s32 1, %s899_s17  ;;  %s31_s23 = ssub.s32 %s903_s18, %s966_s21 }
   0xe   : > { %p41_p0 = scmp.ne.s32.totalorder %s899_s17, %s895_s16  ;;  %p32_p1 = scmp.eq.s32.totalorder %s31_s23, 0 }
   0xf   : > { %p42_p2 = scmp.eq.s32.totalorder %s903_s18, 0  ;;  %p47_p3 = scmp.ne.s32.totalorder %s895_s16, %s891_s15 }
  0x10   : > { %p48_p4 = scmp.eq.s32.totalorder %s962_s19, 0  ;;  %p123_p7 = scmp.eq.s32.totalorder %s962_s19, 3 }
  0x11   : > { %s978_s24 = scalar_select %p32_p1, %s899_s17, %s34_s22  }
  0x12   : > { %p43_p5 = por %p42_p2, %p41_p0  ;;  %p980_p6 = por %p48_p4, %p47_p3 }
  0x13   : > { %1222 = sst [smem:[#allocation16_spill]] %s978_s24  ;;  %p129_p8 = scmp.eq.s32.totalorder %s618_s20, 3 }
  0x14   : > { %s1223_s25 = scalar_select %p980_p6, 1, 0 }
  0x15   : > { %p679_p9 = scmp.lt.s32.totalorder %s903_s18, 4  ;;  %p986_p10 = por %p123_p7, %p41_p0 }
  0x16   : > { %p990_p11 = por %p129_p8, %p47_p3  ;;  %s995_s28 = sand.u32 1, %s899_s17  }
  0x17   : > { %s1224_s26 = scalar_select %p986_p10, 1, 0 }
  0x18   : > { %s1225_s27 = scalar_select %p990_p11, 1, 0 }
  0x19   : > { %s1216_s29 = sshll.u32 %s903_s18, 7  ;;  %s1215_s30 = sshll.u32 %s995_s28, 3 }
  0x1a   : > { %p999_p12 = pnand %p679_p9, %p43_p5  ;;  %s194_s6 = sand.u32 1, %s903_s18  }
  0x1b   : > { %s1227_s1 = sld [smem:[#allocation17_spill]]  ;;  %s198_s10 = scalar_lea.vmem [#allocation5], %s1215_s30 }
  0x1c   : > { %s206_s11 = sshll.u32 %s198_s10, 4  ;;  %s627_s12 = sshll.u32 %s995_s28, 5  ;;  %s207_s11 = int_to_ptr.vmem [resolvable:$true] %s206_s11 }
  0x1d   : > { %s1014_s13 = scalar_lea.sflag [#allocation6], %s194_s6  ;;  %p1020_p0 = pneg %p999_p12 }
  0x21   : > { %s1009_s9 = scalar_lea.hbm %s1227_s1, %s1216_s29  ;;  %s726_s7 = scalar_lea.hbm %s1227_s1, 512 }
  0x22   : > { %s721_s14 = scalar_lea.hbm %s1009_s9, 128  ;;  %p727_p3 = scmp.lt.s32.totalorder %s1009_s9, %s1227_s1 }
  0x23   : > { %p722_p13 = scmp.ne.s32.totalorder %s1009_s9, %s721_s14  ;;  %p728_p4 = scmp.lt.s32.totalorder %s726_s7, %s721_s14 }
  0x25   : > { %p724_p1 = pnand %p1020_p0, %p722_p13  ;;  %p729_p5 = por %p728_p4, %p727_p3 }
  0x27   : > { %p725_p2 = pneg %p724_p1 }
  0x29   : > { %p730_p7 = pnand %p729_p5, %p725_p2 }
  0x2b   : > { %733 = shalt.err (!%p730_p7)
}
  0x2c   : > { %s734_s6 = scalar_lea.vmem %s207_s11, 128  ;;  %s905_s30 = smov [#allocation5]  }
  0x2d   : > { %p735_p8 = scmp.ne.s32.totalorder %s207_s11, %s734_s6  ;;  %s739_s29 = sshll.u32 %s905_s30, 4  ;;  %s740_s29 = int_to_ptr.vmem [resolvable:$false] %s739_s29 }
  0x2e   : > { %s741_s24 = scalar_lea.vmem %s740_s29, 256  ;;  %p742_p13 = scmp.lt.s32.totalorder %s207_s11, %s740_s29 }
  0x2f   : > { %p737_p9 = pnand %p735_p8, %p1020_p0  ;;  %p743_p1 = scmp.lt.s32.totalorder %s741_s24, %s734_s6 }
  0x31   : > { %p738_p11 = pneg %p737_p9  ;;  %p744_p10 = por %p743_p1, %p742_p13 }
  0x33   : > { %p745_p6 = pnand %p744_p10, %p738_p11 }
  0x35   : > { %748 = shalt.err (!%p745_p6)
}
  0x36   : > { %668 = dma.hbm_to_vmem [thread:$0]  (!%p999_p12), %s1009_s9, 128, %s207_s11, %s1014_s13  }
  0x37   : > { %p630_p2 = scmp.ge.s32.totalorder %s903_s18, 1  ;;  %s217_s30 = scalar_lea.vmem [#allocation7], %s627_s12 }
  0x38   : > { %s224_s14 = sshll.u32 %s217_s30, 4  ;;  %p232_p3 = scmp.lt.s32.totalorder %s903_s18, 5  ;;  %s1041_s14 = int_to_ptr.vmem [resolvable:$true] %s224_s14 }
  0x39   : > { %s1230_s29 = sshll.u32 %s903_s18, 7  ;;  %s1231_s8 = sshll.u32 %s995_s28, 3 }
  0x3a   : > { %p1043_p10 = pnand %p630_p2, %p232_p3  ;;  %s1052_s7 = scalar_lea.hbm %s1210_s0, %s1230_s29 }
  0x3b   : > { %s179_s9 = scalar_lea.vmem [#allocation2], %s1231_s8  ;;  %s649_s12 = sshll.u32 %s903_s18, 8 }
  0x3c   : > { %s1229_s24 = scalar_select %p1043_p10, 1, 0 }
  0x3d   : > { %s187_s11 = sshll.u32 %s179_s9, 4  ;;  %s176_s10 = scalar_lea.sflag [#allocation3], %s995_s28  ;;  %s188_s11 = int_to_ptr.vmem [resolvable:$true] %s187_s11 }
  0x3e   : > { %s749_s6 = scalar_lea.hbm %s1052_s7, 128  ;;  %s754_s22 = scalar_lea.hbm %s1210_s0, 512 }
  0x3f   : > { %p750_p6 = scmp.ne.s32.totalorder %s1052_s7, %s749_s6  ;;  %p755_p5 = scmp.lt.s32.totalorder %s1052_s7, %s1210_s0 }
  0x40   : > { %p756_p7 = scmp.lt.s32.totalorder %s754_s22, %s749_s6 }
  0x41   : > { %p752_p11 = pnand %p750_p6, %p1020_p0 }
  0x42   : > { %p757_p8 = por %p756_p7, %p755_p5 }
  0x43   : > { %p753_p4 = pneg %p752_p11 }
  0x45   : > { %p758_p9 = pnand %p757_p8, %p753_p4 }
  0x47   : > { %761 = shalt.err (!%p758_p9)
}
  0x48   : > { %s762_s8 = scalar_lea.vmem %s188_s11, 128  ;;  %s906_s28 = smov [#allocation2]  }
  0x49   : > { %p763_p13 = scmp.ne.s32.totalorder %s188_s11, %s762_s8  ;;  %s767_s9 = sshll.u32 %s906_s28, 4  ;;  %s768_s9 = int_to_ptr.vmem [resolvable:$false] %s767_s9 }
  0x4a   : > { %s769_s17 = scalar_lea.vmem %s768_s9, 256  ;;  %p770_p3 = scmp.lt.s32.totalorder %s188_s11, %s768_s9 }
  0x4b   : > { %p765_p1 = pnand %p763_p13, %p1020_p0  ;;  %p771_p6 = scmp.lt.s32.totalorder %s769_s17, %s762_s8 }
  0x4d   : > { %p766_p2 = pneg %p765_p1  ;;  %p772_p11 = por %p771_p6, %p770_p3 }
  0x4f   : > { %p773_p10 = pnand %p772_p11, %p766_p2 }
  0x51   : > { %776 = shalt.err (!%p773_p10)
}
  0x52   : > { %665 = dma.hbm_to_vmem [thread:$0]  (!%p999_p12), %s1052_s7, 128, %s188_s11, %s176_s10  }
  0x53   : > { %s1077_s30 = scalar_lea.hbm %s1212_s2, %s649_s12  ;;  %s782_s23 = scalar_lea.hbm %s1212_s2, 2048 }
  0x54   : > { %s777_s22 = scalar_lea.hbm %s1077_s30, 512  ;;  %p783_p10 = scmp.lt.s32.totalorder %s1077_s30, %s1212_s2 }
  0x55   : > { %p778_p4 = scmp.ne.s32.totalorder %s1077_s30, %s777_s22  ;;  %p784_p8 = scmp.lt.s32.totalorder %s782_s23, %s777_s22 }
  0x57   : > { %p780_p5 = pnand %p778_p4, %p1020_p0  ;;  %p785_p9 = por %p784_p8, %p783_p10 }
  0x59   : > { %p781_p7 = pneg %p780_p5 }
  0x5b   : > { %p786_p13 = pnand %p785_p9, %p781_p7 }
  0x5d   : > { %789 = shalt.err (!%p786_p13)
}
  0x5e   : > { %s790_s7 = scalar_lea.vmem %s1041_s14, 512  ;;  %s907_s11 = smov [#allocation7]  }
  0x5f   : > { %p791_p1 = scmp.ne.s32.totalorder %s1041_s14, %s790_s7  ;;  %s795_s12 = sshll.u32 %s907_s11, 4  ;;  %s796_s12 = int_to_ptr.vmem [resolvable:$false] %s795_s12 }
  0x60   : > { %s797_s10 = scalar_lea.vmem %s796_s12, 1024  ;;  %p798_p6 = scmp.lt.s32.totalorder %s1041_s14, %s796_s12 }
  0x61   : > { %p793_p2 = pnand %p791_p1, %p1020_p0  ;;  %p799_p11 = scmp.lt.s32.totalorder %s797_s10, %s790_s7 }
  0x63   : > { %p794_p3 = pneg %p793_p2  ;;  %p800_p4 = por %p799_p11, %p798_p6 }
  0x65   : > { %p801_p5 = pnand %p800_p4, %p794_p3 }
  0x67   : > { %804 = shalt.err (!%p801_p5)
}
  0x68   : > { %s908_s9 = smov 1024   ;;  %s909_s1 = smov 256  }
  0x69   : > { %s910_s6 = smov 16   ;;  %p1232_p0 = scmp.ne.s32.totalorder %s1229_s24, 0 }
  0x6a   : > { %671 = dma.hbm_to_vmem [thread:$0]  (!%p999_p12), %s1077_s30, 512, %s1041_s14, %s1014_s13, %s908_s9, %s909_s1, %s910_s6  }
  0x6b   : > { %236 = sbr.rel (%p1232_p0) target bundleno = 179 (0xb3), region = 32  ;;  %s1103_s20 = sand.u32 (!%p1232_p0), 1, %s895_s16  }
  0x6c   : > { %s1106_s22 = sshll.u32 (!%p1232_p0), %s1103_s20, 3  ;;  %s239_s17 = scalar_lea.sflag (!%p1232_p0), [#allocation3], %s1103_s20 }
  0x6d   : > { %s242_s29 = scalar_lea.vmem (!%p1232_p0), [#allocation2], %s1106_s22  ;;  %p1233_p7 = scmp.ne.s32.totalorder (!%p1232_p0), %s1223_s25, 0 }
  0x70   : > { %874 = dma.done.wait (%p1233_p7), %s239_s17, 128  }
  0x71   : > { %876 = vsyncadd (%p1233_p7), %s239_s17, 4294967168  ;;  %s247_s5 = sand.u32 1, %s962_s19   ;;  %s251_s14 = scalar_lea.vmem [#allocation5], %s1106_s22 }
  0x72   : > { %s248_s13 = scalar_lea.sflag [#allocation6], %s247_s5 }
  0x73   : > { %878 = dma.done.wait (%p1233_p7), %s248_s13, 640  }
  0x74   : > { %880 = vsyncadd (%p1233_p7), %s248_s13, 4294966656  ;;  %s633_s24 = sshll.u32 %s1103_s20, 5  ;;  %v305_v0 = vld [vmem:[%s242_s29] sm:$0xff]  ;;  %v306_v1 = vld [vmem:[%s251_s14] sm:$0xff]  ;;  %s651_s8 = sshll.u32 %s962_s19, 8 }
  0x75   : > { %v312_v2 = vrot.slane %v305_v0, 6  ;;  %v327_v3 = vmul.f32 1.442695, %v306_v1  ;;  %s260_s30 = scalar_lea.vmem [#allocation7], %s633_s24  ;;  %s1125_s25 = scalar_lea.vmem [#allocation9], %s633_s24 }
  0x76   : > { %v307_v5 = vld [vmem:[%s260_s30] sm:$0xff]  ;;  %v308_v6 = vld [vmem:[%s260_s30 + $0x8] sm:$0xff]  ;;  %v309_v14 = vld [vmem:[%s260_s30 + $0x10] sm:$0x3]  ;;  %s470_s23 = sshll.u32 %s1125_s25, 4  ;;  %s1141_s11 = scalar_lea.hbm %s1214_s4, %s651_s8  ;;  %s1132_s23 = int_to_ptr.vmem [resolvable:$true] %s470_s23 }
  0x77   : > { %v314_v4 = vsub.f32 %v305_v0, %v312_v2  ;;  %719 = vpow2.f32 %v327_v3  ;;  %v310_v18 = vld [vmem:[%s260_s30 + $0x18] sm:$0x3]  ;;  %s443_s12 = scalar_lea.sflag [#allocation10], %s1103_s20  ;;  %s805_s10 = scalar_lea.vmem %s1132_s23, 512 }
  0x78   : > { %p806_p12 = scmp.ne.s32.totalorder %s1132_s23, %s805_s10  ;;  %p1234_p10 = scmp.ne.s32.totalorder %s1224_s26, 0 }
  0x79   : > { %v315_v7 = vmul.f32 0.5, %v314_v4  ;;  %v346_v8 = vcombine.high %v314_v4, %v314_v4  ;;  %v347_v9 = vrot.slane %v314_v4, 2  ;;  %v322_v10 = vrot.slane %v314_v4, 6  ;;  %s911_s9 = smov [#allocation9]  }
  0x7a   : > { %v366_v11 = vmul.f32 %v314_v4, %v307_v5  ;;  %v402_v12 = vcombine.low %v314_v4, %v314_v4  ;;  %v405_v13 = vmul.f32 %v314_v4, %v308_v6  ;;  %p807_p8 = pnand %p806_p12, %p1234_p10  ;;  %s809_s1 = sshll.u32 %s911_s9, 4  ;;  %s810_s1 = int_to_ptr.vmem [resolvable:$false] %s809_s1 }
  0x7b   : > { %v636_v15 = vrot.slane %v315_v7, 10  ;;  %v348_v16 = vrot.slane %v346_v8, 2  ;;  %v351_v17 = vmul.f32 %v347_v9, %v307_v5  ;;  %v367_v19 = vmul.f32 %v346_v8, %v308_v6  ;;  %s811_s6 = scalar_lea.vmem %s810_s1, 1024  ;;  %p812_p13 = scmp.lt.s32.totalorder %s1132_s23, %s810_s1 }
  0x7c   : > { %v385_v20 = vrot.slane %v346_v8, 6  ;;  %v388_v21 = vmul.f32 %v322_v10, %v307_v5  ;;  %v404_v22 = vmul.f32 %v402_v12, %v307_v5  ;;  %v423_v25 = vmul.f32 %v347_v9, %v309_v14  ;;  %p808_p9 = pneg %p807_p8  ;;  %p813_p1 = scmp.lt.s32.totalorder %s811_s6, %s805_s10 }
  0x7d   : > { %v320_v23 = vadd.f32 %v636_v15, %v305_v0  ;;  %v352_v24 = vmul.f32 %v348_v16, %v308_v6  ;;  %v370_v26 = vcombine.low %v366_v11, %v367_v19  ;;  %v424_v29 = vmul.f32 %v348_v16, %v310_v18 }
  0x7e   : > { %v389_v27 = vmul.f32 %v385_v20, %v308_v6  ;;  %v408_v28 = vcombine.high %v404_v22, %v405_v13  ;;  %v323_v35 = vrot.slane %v322_v10, 4  ;;  %p814_p2 = por %p813_p1, %p812_p13 }
  0x7f   : > { %v355_v30 = vcombine.low %v351_v17, %v352_v24  ;;  %v637_v31 = vrot.slane %v370_v26, 10  ;;  %v427_v34 = vcombine.low %v423_v25, %v424_v29 }
  0x80   : > { %v392_v32 = vcombine.high %v388_v21, %v389_v27  ;;  %v638_v33 = vrot.slane %v408_v28, 10  ;;  %v325_v47 = vmul.f32 %v323_v35, %v306_v1  ;;  %p815_p3 = pnand %p814_p2, %p808_p9 }
  0x81   : > { %v357_v36 = vadd.f32 %v355_v30, %v320_v23  ;;  %v374_v37 = vadd.f32 %v637_v31, %v320_v23  ;;  %v429_v40 = vadd.f32 %v427_v34, %v320_v23 }
  0x82   : > { %v394_v38 = vadd.f32 %v392_v32, %v320_v23  ;;  %v412_v39 = vadd.f32 %v638_v33, %v320_v23  ;;  %v326_v60 = vadd.f32 %v325_v47, %v320_v23 }
  0x83   : > { %v358_v41 = vmax.f32 %v357_v36, 0.0  ;;  %v375_v43 = vmax.f32 %v374_v37, 0.0  ;;  %v430_v46 = vmax.f32 %v429_v40, 0.0 }
  0x84   : > { %v720_v42 = vpop.eup %719  ;;  %v395_v44 = vmax.f32 %v394_v38, 0.0  ;;  %v413_v45 = vmax.f32 %v412_v39, 0.0 }
  0x85   : > { %v329_v48 = vmul.f32 0.5, %v720_v42  ;;  %v359_v49 = vmin.f32 %v358_v41, 16.0  ;;  %v376_v50 = vmin.f32 %v375_v43, 16.0  ;;  %v431_v53 = vmin.f32 %v430_v46, 16.0 }
  0x86   : > { %v396_v51 = vmin.f32 %v395_v44, 16.0  ;;  %v414_v52 = vmin.f32 %v413_v45, 16.0 }
  0x87   : > { %v330_v54 = vmul.f32 %v329_v48, %v314_v4  ;;  %363 = vst [vmem:[%s1125_s25] sm:$0x3] %v359_v49  ;;  %v361_v55 = vcombine.high %v359_v49, %v359_v49  ;;  %v379_v56 = vrot.slane %v376_v50, 6  ;;  %v378_v57 = vcombine.high %v376_v50, %v376_v50  ;;  %435 = vst [vmem:[%s1125_s25 + $0x10] sm:$0x3] %v431_v53 }
  0x88   : > { %v398_v58 = vcombine.low %v396_v51, %v396_v51  ;;  %401 = vst [vmem:[%s1125_s25 + $0x8] sm:$0x30] %v396_v51  ;;  %v417_v59 = vrot.slane %v414_v52, 2  ;;  %v416_v62 = vcombine.high %v414_v52, %v414_v52  ;;  %v433_v63 = vcombine.high %v431_v53, %v431_v53 }
  0x89   : > { %v332_v61 = vrot.slane %v330_v54, 6  ;;  %364 = vst [vmem:[%s1125_s25 + $0x8] sm:$0x3] %v361_v55  ;;  %383 = vst [vmem:[%s1125_s25] sm:$0xc] %v379_v56  ;;  %v380_v0 = vrot.slane %v378_v57, 6 }
  0x8a   : > { %400 = vst [vmem:[%s1125_s25] sm:$0x30] %v398_v58  ;;  %421 = vst [vmem:[%s1125_s25] sm:$0xc0] %v417_v59  ;;  %v418_v2 = vrot.slane %v416_v62, 2 }
  0x8b   : > { %v333_v1 = vrot.slane %v332_v61, 4  ;;  %436 = vst [vmem:[%s1125_s25 + $0x18] sm:$0x3] %v433_v63  ;;  %384 = vst [vmem:[%s1125_s25 + $0x8] sm:$0xc] %v380_v0 }
  0x8c   : > { %422 = vst [vmem:[%s1125_s25 + $0x8] sm:$0xc0] %v418_v2 }
  0x8d   : > { %v335_v3 = vsub.f32 %v326_v60, %v333_v1  ;;  %v339_v4 = vadd.f32 %v333_v1, %v326_v60 }
  0x8e   : > { %818 = shalt.err (!%p815_p3)
}
  0x8f   : > { %s819_s17 = scalar_lea.hbm %s1141_s11, 512  ;;  %s823_s13 = scalar_lea.hbm %s1214_s4, 2048 }
  0x90   : > { %p820_p6 = scmp.ne.s32.totalorder %s1141_s11, %s819_s17  ;;  %p824_p5 = scmp.lt.s32.totalorder %s1141_s11, %s1214_s4 }
  0x91   : > { %p825_p0 = scmp.lt.s32.totalorder %s823_s13, %s819_s17 }
  0x92   : > { %p821_p11 = pnand %p820_p6, %p1234_p10 }
  0x93   : > { %p826_p7 = por %p825_p0, %p824_p5 }
  0x94   : > { %p822_p4 = pneg %p821_p11 }
  0x96   : > { %p827_p12 = pnand %p826_p7, %p822_p4 }
  0x98   : > { %830 = shalt.err (!%p827_p12)
}
  0x99   : > { %s912_s30 = smov 256   ;;  %s913_s25 = smov 1024   ;;  %v336_v5 = vmax.f32 %v335_v3, 0.0  ;;  %v340_v6 = vmax.f32 %v339_v4, 0.0 }
  0x9a   : > { %s914_s8 = smov 16   ;;  %s292_s28 = scalar_lea.vmem [#allocation8], %s1106_s22 }
  0x9b   : > { %659 = dma.vmem_to_hbm [thread:$0]  (%p1234_p10), %s1132_s23, 512, %s1141_s11, %s443_s12, %s912_s30, %s913_s25, %s914_s8   ;;  %v337_v7 = vmin.f32 %v336_v5, 16.0  ;;  %v341_v8 = vmin.f32 %v340_v6, 16.0 }
  0x9c   : > { %s457_s7 = sshll.u32 %s292_s28, 4  ;;  %s650_s10 = sshll.u32 %s962_s19, 7  ;;  %s1171_s7 = int_to_ptr.vmem [resolvable:$true] %s457_s7 }
  0x9d   : > { %338 = vst [vmem:[%s292_s28] sm:$0x33] %v337_v7  ;;  %v343_v9 = vrot.slane %v341_v8, 6  ;;  %s455_s6 = scalar_lea.hbm %s1213_s3, %s650_s10  ;;  %s438_s23 = scalar_lea.sflag [#allocation4], %s1103_s20 }
  0x9e   : > { %s831_s11 = scalar_lea.vmem %s1171_s7, 128  ;;  %s915_s19 = smov [#allocation8]  }
  0x9f   : > { %345 = vst [vmem:[%s292_s28] sm:$0xcc] %v343_v9  ;;  %p832_p8 = scmp.ne.s32.totalorder %s1171_s7, %s831_s11  ;;  %s835_s22 = sshll.u32 %s915_s19, 4  ;;  %s836_s22 = int_to_ptr.vmem [resolvable:$false] %s835_s22 }
  0xa0   : > { %s837_s12 = scalar_lea.vmem %s836_s22, 256  ;;  %p838_p1 = scmp.lt.s32.totalorder %s1171_s7, %s836_s22 }
  0xa1   : > { %p833_p9 = pnand %p832_p8, %p1234_p10  ;;  %p839_p2 = scmp.lt.s32.totalorder %s837_s12, %s831_s11 }
  0xa3   : > { %p834_p13 = pneg %p833_p9  ;;  %p840_p3 = por %p839_p2, %p838_p1 }
  0xa5   : > { %p841_p6 = pnand %p840_p3, %p834_p13 }
  0xa7   : > { %844 = shalt.err (!%p841_p6)
}
  0xa8   : > { %s845_s17 = scalar_lea.hbm %s455_s6, 128  ;;  %s849_s5 = scalar_lea.hbm %s1213_s3, 512 }
  0xa9   : > { %p846_p11 = scmp.ne.s32.totalorder %s455_s6, %s845_s17  ;;  %p850_p0 = scmp.lt.s32.totalorder %s455_s6, %s1213_s3 }
  0xaa   : > { %p851_p7 = scmp.lt.s32.totalorder %s849_s5, %s845_s17 }
  0xab   : > { %p847_p4 = pnand %p846_p11, %p1234_p10 }
  0xac   : > { %p852_p12 = por %p851_p7, %p850_p0 }
  0xad   : > { %p848_p5 = pneg %p847_p4 }
  0xaf   : > { %p853_p8 = pnand %p852_p12, %p848_p5 }
  0xb1   : > { %856 = shalt.err (!%p853_p8)
}
  0xb2   : > { %658 = dma.vmem_to_hbm [thread:$0]  (%p1234_p10), %s1171_s7, 128, %s455_s6, %s438_s23  }
  0xb3 PF: > { %p680_p9 = scmp.ge.s32.totalorder %s903_s18, 2  ;;  %s485_s24 = sand.u32 1, %s891_s15  }
  0xb4   : > { %p1235_p13 = scmp.ne.s32.totalorder %s1225_s27, 0  ;;  %s486_s30 = scalar_lea.sflag [#allocation4], %s485_s24 }
  0xb6   : > { %p673_p1 = pnand %p680_p9, %p1235_p13 }
  0xb8   : > { %p674_p2 = pneg %p673_p1 }
  0xba   : > { %882 = dma.done.wait (%p674_p2), %s486_s30, 128  }
  0xbb   : > { %884 = vsyncadd (%p674_p2), %s486_s30, 4294967168  ;;  %s495_s25 = scalar_lea.sflag [#allocation10], %s485_s24 }
  0xbc   : > { %886 = dma.done.wait (%p674_p2), %s495_s25, 512  }
  0xbd   : > { %888 = vsyncadd (%p674_p2), %s495_s25, 4294966784  ;;  %s1236_s26 = sld [smem:[#allocation15_spill]]  ;;  %p24_p10 = scmp.ge.s32.totalorder %s966_s21, 6  }
  0xbe   : > { %s1237_s17 = sld [smem:[#allocation16_spill]]  ;;  %s1238_s15 = smov %s895_s16 }
  0xbf   : > { %s1240_s18 = smov %s966_s21  ;;  %26 = sbr.rel (!%p24_p10) target bundleno = 11 (0xb), region = 118 }
  0xc3   : > { %s1239_s16 = smov %s1236_s26 }
  0xc4   :  { %500 = vsyncpa [#allocation3], 1 }
  0xc5   :  { %502 = vsyncpa [#allocation3 + $0x1], 1 }
  0xc6   :  { %503 = vsyncpa [#allocation6], 1 }
  0xc7   :  { %505 = vsyncpa [#allocation6 + $0x1], 1 }
  0xc8   :  { %506 = vsyncpa [#allocation4], 1 }
  0xc9   :  { %508 = vsyncpa [#allocation4 + $0x1], 1 }
  0xca   :  { %509 = vsyncpa [#allocation10], 1 }
  0xcb   :  { %511 = vsyncpa [#allocation10 + $0x1], 1 }

</bundles_post_ra>
